<compile_context>
chip_gen: v5e
topology: v5e:2x2
jax: 0.10.0
libtpu: 0.0.40
codegen_flags: <defaults>
</compile_context>

<pallas_src>
import functools

import jax
import jax.numpy as jnp
from jax.experimental import pallas as pl
from jax.experimental.pallas import tpu as pltpu


def _round_up(x, m):
    return (x + m - 1) // m * m


def _focal_loss_kernel(logits_ref, targets_ref, alpha_ref, out_ref, *,
                       gamma, reduction, scale):
    i = pl.program_id(0)

    x = logits_ref[...].astype(jnp.float32)        # (TILE_N, C)  cast after DMA
    t = targets_ref[...]                           # (TILE_N, 1)  int32
    a = alpha_ref[...].astype(jnp.float32)         # (1, C)

    # Numerically stable log-softmax pieces (never materialize full logp).
    m = jnp.max(x, axis=-1, keepdims=True)                      # (TILE_N, 1)
    z = x - m
    lse = jnp.log(jnp.sum(jnp.exp(z), axis=-1, keepdims=True))  # (TILE_N, 1)

    # One-hot gather of target class via masked reduces (no dynamic lane gather).
    col = jax.lax.broadcasted_iota(jnp.int32, x.shape, 1)       # (TILE_N, C)
    mask = col == t                                             # padded rows (t=-1): all False
    z_t = jnp.sum(jnp.where(mask, z, 0.0), axis=-1, keepdims=True)
    a_t = jnp.sum(jnp.where(mask, a, 0.0), axis=-1, keepdims=True)

    ce = -a_t * (z_t - lse)          # weighted CE, reduction='none'; 0 for padded rows
    pt = jnp.exp(-ce)
    base = 1.0 - pt

    g = float(gamma)
    if g.is_integer() and g >= 0:
        w = jnp.ones_like(base)
        for _ in range(int(g)):      # gamma==2 -> w = base*base (VPU only, no EUP pow)
            w = w * base
    else:
        w = base ** g
    focal = w * ce                   # (TILE_N, 1); 0 for padded rows

    if reduction == "none":
        out_ref[...] = focal
    else:
        @pl.when(i == 0)
        def _init():
            out_ref[...] = jnp.zeros_like(out_ref)

        out_ref[...] += jnp.sum(focal, axis=0, keepdims=True)   # (1, 1) partial

        @pl.when(i == pl.num_programs(0) - 1)
        def _finish():
            out_ref[...] = out_ref[...] * scale                 # 1/true_N or 1.0


def focal_loss(logits, targets, alpha=None, gamma=2.0, reduction="mean",
               tile_n=None):
    """logits: (N, C) f32/bf16, targets: (N,) int, alpha: (C,) or None."""
    N, C = logits.shape
    if alpha is None:
        alpha = jnp.ones((C,), dtype=jnp.float32)
    alpha_2d = jnp.asarray(alpha, dtype=jnp.float32).reshape(1, C)

    # Tile size: multiple of 8 sublanes; cap so a double-buffered logits stream
    # stays well inside scoped VMEM (v7x only has 64 MiB physical).
    itemsize = jnp.dtype(logits.dtype).itemsize
    if tile_n is None:
        cap = max(8, (8 * 1024 * 1024) // max(1, C * itemsize))   # ~8 MiB / buffer
        tile_n = min(_round_up(N, 8), _round_up(min(cap, 2048), 8))
    tile_n = max(8, _round_up(int(tile_n), 8))
    n_pad = _round_up(N, tile_n)
    num_tiles = n_pad // tile_n

    # Pad rows; padded targets = -1 contribute exactly 0 to the loss.
    logits_p = jnp.pad(logits, ((0, n_pad - N), (0, 0)))
    targets_p = jnp.pad(targets.astype(jnp.int32), (0, n_pad - N),
                        constant_values=-1).reshape(n_pad, 1)

    scale = (1.0 / N) if reduction == "mean" else 1.0
    kernel = functools.partial(_focal_loss_kernel, gamma=float(gamma),
                               reduction=reduction, scale=scale)

    if reduction == "none":
        out_shape = jax.ShapeDtypeStruct((n_pad, 1), jnp.float32)
        out_spec = pl.BlockSpec((tile_n, 1), lambda i: (i, 0))
        dims = ("parallel",)
    else:
        out_shape = jax.ShapeDtypeStruct((1, 1), jnp.float32)
        out_spec = pl.BlockSpec((1, 1), lambda i: (0, 0))   # resident accumulator
        dims = ("arbitrary",)

    # Explicit VMEM budget: double-buffered logits + targets + alpha + headroom.
    need = 2 * tile_n * C * itemsize + 2 * tile_n * 4 + 4 * C + (2 << 20)
    vmem_limit = int(min(max(2 * need, 32 << 20), 48 << 20))

    out = pl.pallas_call(
        kernel,
        out_shape=out_shape,
        grid_spec=pltpu.PrefetchScalarGridSpec(
            num_scalar_prefetch=0,
            grid=(num_tiles,),
            in_specs=[
                pl.BlockSpec((tile_n, C), lambda i: (i, 0)),   # logits (native dtype)
                pl.BlockSpec((tile_n, 1), lambda i: (i, 0)),   # targets
                pl.BlockSpec((1, C), lambda i: (0, 0)),        # alpha (resident)
            ],
            out_specs=out_spec,
        ),
        compiler_params=pltpu.CompilerParams(
            dimension_semantics=dims,
            vmem_limit_bytes=vmem_limit),
    )(logits_p, targets_p, alpha_2d)

    if reduction == "none":
        return out[:N, 0]
    return out[0, 0]


def focal_loss_ref(logits, targets, alpha=None, gamma=2.0, reduction="mean"):
    """Pure-JAX reference matching the PyTorch module."""
    x = logits.astype(jnp.float32)
    C = x.shape[-1]
    if alpha is None:
        alpha = jnp.ones((C,), jnp.float32)
    logp = jax.nn.log_softmax(x, axis=-1)
    logp_t = jnp.take_along_axis(logp, targets[:, None].astype(jnp.int32),
                                 axis=-1)[:, 0]
    ce = -alpha[targets] * logp_t
    pt = jnp.exp(-ce)
    focal = (1.0 - pt) ** gamma * ce
    if reduction == "mean":
        return focal.mean()
    if reduction == "sum":
        return focal.sum()
    return focal


if __name__ == "__main__":
    key = jax.random.PRNGKey(0)
    k1, k2 = jax.random.split(key)

    N, C = 8, 16
    logits = jax.random.normal(k1, (N, C), dtype=jnp.float32)
    targets = jax.random.randint(k2, (N,), 0, C, dtype=jnp.int32)
    alpha = 0.5 + 0.05 * jnp.arange(C, dtype=jnp.float32)

    # reduction='mean' (module default)
    out_mean = jax.block_until_ready(focal_loss(logits, targets, alpha, 2.0, "mean"))
    ref_mean = focal_loss_ref(logits, targets, alpha, 2.0, "mean")
    assert jnp.allclose(out_mean, ref_mean, rtol=1e-5, atol=1e-5), (out_mean, ref_mean)

    # reduction='sum'
    out_sum = jax.block_until_ready(focal_loss(logits, targets, alpha, 2.0, "sum"))
    ref_sum = focal_loss_ref(logits, targets, alpha, 2.0, "sum")
    assert jnp.allclose(out_sum, ref_sum, rtol=1e-5, atol=1e-5), (out_sum, ref_sum)

    # reduction='none'
    out_none = jax.block_until_ready(focal_loss(logits, targets, alpha, 2.0, "none"))
    ref_none = focal_loss_ref(logits, targets, alpha, 2.0, "none")
    assert jnp.allclose(out_none, ref_none, rtol=1e-5, atol=1e-5), (out_none, ref_none)

    # native bf16 DMA path (cast to f32 inside the kernel)
    logits_bf16 = logits.astype(jnp.bfloat16)
    out_bf = jax.block_until_ready(focal_loss(logits_bf16, targets, alpha, 2.0, "mean"))
    ref_bf = focal_loss_ref(logits_bf16, targets, alpha, 2.0, "mean")
    assert jnp.allclose(out_bf, ref_bf, rtol=1e-2, atol=1e-2), (out_bf, ref_bf)

    # multi-tile + padded-row path (N not a multiple of tile_n)
    N2 = 40
    k3, k4 = jax.random.split(k1)
    logits2 = jax.random.normal(k3, (N2, C), dtype=jnp.float32)
    targets2 = jax.random.randint(k4, (N2,), 0, C, dtype=jnp.int32)
    out2 = jax.block_until_ready(
        focal_loss(logits2, targets2, alpha, 2.0, "mean", tile_n=16))
    ref2 = focal_loss_ref(logits2, targets2, alpha, 2.0, "mean")
    assert jnp.allclose(out2, ref2, rtol=1e-5, atol=1e-5), (out2, ref2)

    print("KERNEL_OK")
</pallas_src>

<mosaic_0001>
module attributes {stable_mosaic.version = 11 : i64} {
  func.func @_focal_loss_kernel(%arg0: i32, %arg1: memref<8x16xf32, #tpu.memory_space<vmem>>, %arg2: memref<8x1xi32, #tpu.memory_space<vmem>>, %arg3: memref<1x16xf32, #tpu.memory_space<vmem>>, %arg4: memref<1x1xf32, #tpu.memory_space<vmem>>) attributes {dimension_semantics = [#tpu.dimension_semantics<arbitrary>], iteration_bounds = array<i64: 1>, scalar_prefetch = 0 : i64, scratch_operands = 0 : i64, tpu.core_type = #tpu.core_type<tc>, window_params = [{transform_indices = @transform_0, window_bounds = array<i64: 8, 16>}, {transform_indices = @transform_1, window_bounds = array<i64: 8, 1>}, {pipeline_mode = #tpu.pipeline_mode<synchronous>, transform_indices = @transform_2, window_bounds = array<i64: 1, 16>}, {pipeline_mode = #tpu.pipeline_mode<synchronous>, transform_indices = @transform_3, window_bounds = array<i64: 1, 1>}]} {
    %c0 = arith.constant 0 : index
    %c0_0 = arith.constant 0 : index
    %0 = vector.load %arg1[%c0, %c0_0] : memref<8x16xf32, #tpu.memory_space<vmem>>, vector<8x16xf32>
    %c0_1 = arith.constant 0 : index
    %c0_2 = arith.constant 0 : index
    %1 = vector.load %arg2[%c0_1, %c0_2] : memref<8x1xi32, #tpu.memory_space<vmem>>, vector<8x1xi32>
    %c0_3 = arith.constant 0 : index
    %c0_4 = arith.constant 0 : index
    %2 = vector.load %arg3[%c0_3, %c0_4] : memref<1x16xf32, #tpu.memory_space<vmem>>, vector<1x16xf32>
    %cst = arith.constant dense<0xFF800000> : vector<8xf32>
    %3 = vector.multi_reduction <maximumf>, %0, %cst [1] : vector<8x16xf32> to vector<8xf32>
    %4 = vector.shape_cast %3 : vector<8xf32> to vector<8x1xf32>
    %5 = vector.broadcast %4 : vector<8x1xf32> to vector<8x16xf32>
    %6 = arith.subf %0, %5 : vector<8x16xf32>
    %7 = math.exp %6 : vector<8x16xf32>
    %cst_5 = arith.constant dense<0.000000e+00> : vector<8xf32>
    %8 = vector.multi_reduction <add>, %7, %cst_5 [1] : vector<8x16xf32> to vector<8xf32>
    %9 = vector.shape_cast %8 : vector<8xf32> to vector<8x1xf32>
    %10 = math.log %9 : vector<8x1xf32>
    %11 = tpu.iota {dimensions = array<i32: 1>} : vector<8x16xi32>
    %12 = vector.broadcast %1 : vector<8x1xi32> to vector<8x16xi32>
    %13 = arith.cmpi eq, %11, %12 : vector<8x16xi32>
    %cst_6 = arith.constant 0.000000e+00 : f32
    %14 = vector.broadcast %cst_6 : f32 to vector<8x16xf32>
    %15 = arith.select %13, %6, %14 : vector<8x16xi1>, vector<8x16xf32>
    %cst_7 = arith.constant dense<0.000000e+00> : vector<8xf32>
    %16 = vector.multi_reduction <add>, %15, %cst_7 [1] : vector<8x16xf32> to vector<8xf32>
    %17 = vector.shape_cast %16 : vector<8xf32> to vector<8x1xf32>
    %cst_8 = arith.constant 0.000000e+00 : f32
    %18 = vector.shape_cast %2 : vector<1x16xf32> to vector<1x16xf32>
    %19 = vector.broadcast %18 : vector<1x16xf32> to vector<8x16xf32>
    %20 = vector.broadcast %cst_8 : f32 to vector<8x16xf32>
    %21 = arith.select %13, %19, %20 : vector<8x16xi1>, vector<8x16xf32>
    %cst_9 = arith.constant dense<0.000000e+00> : vector<8xf32>
    %22 = vector.multi_reduction <add>, %21, %cst_9 [1] : vector<8x16xf32> to vector<8xf32>
    %23 = vector.shape_cast %22 : vector<8xf32> to vector<8x1xf32>
    %cst_10 = arith.constant 0.000000e+00 : f32
    %24 = vector.broadcast %cst_10 : f32 to vector<8x1xf32>
    %25 = arith.subf %24, %23 : vector<8x1xf32>
    %26 = arith.subf %17, %10 : vector<8x1xf32>
    %27 = arith.mulf %25, %26 : vector<8x1xf32>
    %cst_11 = arith.constant 0.000000e+00 : f32
    %28 = vector.broadcast %cst_11 : f32 to vector<8x1xf32>
    %29 = arith.subf %28, %27 : vector<8x1xf32>
    %30 = math.exp %29 : vector<8x1xf32>
    %cst_12 = arith.constant 1.000000e+00 : f32
    %31 = vector.broadcast %cst_12 : f32 to vector<8x1xf32>
    %32 = arith.subf %31, %30 : vector<8x1xf32>
    %cst_13 = arith.constant 1.000000e+00 : f32
    %33 = vector.broadcast %cst_13 : f32 to vector<8x1xf32>
    %34 = arith.mulf %33, %32 : vector<8x1xf32>
    %35 = arith.mulf %34, %32 : vector<8x1xf32>
    %36 = arith.mulf %35, %27 : vector<8x1xf32>
    %c0_i32 = arith.constant 0 : i32
    %37 = arith.cmpi eq, %arg0, %c0_i32 : i32
    %38 = arith.extui %37 : i1 to i32
    %c0_i32_14 = arith.constant 0 : i32
    %39 = arith.cmpi ne, %38, %c0_i32_14 : i32
    scf.if %39 {
      %cst_22 = arith.constant 0.000000e+00 : f32
      %48 = vector.broadcast %cst_22 : f32 to vector<1x1xf32>
      %c0_23 = arith.constant 0 : index
      %c0_24 = arith.constant 0 : index
      %49 = vector.load %arg4[%c0_23, %c0_24] : memref<1x1xf32, #tpu.memory_space<vmem>>, vector<1x1xf32>
      tpu.vector_store %arg4[%c0_23, %c0_24], %48 {strides = array<i32>} : memref<1x1xf32, #tpu.memory_space<vmem>>, vector<1x1xf32>,
    } else {
    }
    %c0_15 = arith.constant 0 : index
    %c0_16 = arith.constant 0 : index
    %40 = vector.load %arg4[%c0_15, %c0_16] : memref<1x1xf32, #tpu.memory_space<vmem>>, vector<1x1xf32>
    %cst_17 = arith.constant dense<0.000000e+00> : vector<1xf32>
    %41 = vector.multi_reduction <add>, %36, %cst_17 [0] : vector<8x1xf32> to vector<1xf32>
    %42 = vector.shape_cast %41 : vector<1xf32> to vector<1x1xf32>
    %43 = arith.addf %40, %42 : vector<1x1xf32>
    %c0_18 = arith.constant 0 : index
    %c0_19 = arith.constant 0 : index
    %44 = vector.load %arg4[%c0_18, %c0_19] : memref<1x1xf32, #tpu.memory_space<vmem>>, vector<1x1xf32>
    tpu.vector_store %arg4[%c0_18, %c0_19], %43 {strides = array<i32>} : memref<1x1xf32, #tpu.memory_space<vmem>>, vector<1x1xf32>,
    %c0_i32_20 = arith.constant 0 : i32
    %45 = arith.cmpi eq, %arg0, %c0_i32_20 : i32
    %46 = arith.extui %45 : i1 to i32
    %c0_i32_21 = arith.constant 0 : i32
    %47 = arith.cmpi ne, %46, %c0_i32_21 : i32
    scf.if %47 {
      %c0_22 = arith.constant 0 : index
      %c0_23 = arith.constant 0 : index
      %48 = vector.load %arg4[%c0_22, %c0_23] : memref<1x1xf32, #tpu.memory_space<vmem>>, vector<1x1xf32>
      %cst_24 = arith.constant 1.250000e-01 : f32
      %49 = vector.broadcast %cst_24 : f32 to vector<1x1xf32>
      %50 = arith.mulf %48, %49 : vector<1x1xf32>
      %c0_25 = arith.constant 0 : index
      %c0_26 = arith.constant 0 : index
      %51 = vector.load %arg4[%c0_25, %c0_26] : memref<1x1xf32, #tpu.memory_space<vmem>>, vector<1x1xf32>
      tpu.vector_store %arg4[%c0_25, %c0_26], %50 {strides = array<i32>} : memref<1x1xf32, #tpu.memory_space<vmem>>, vector<1x1xf32>,
    } else {
    }
    return
  }
  func.func @transform_0(%arg0: i32) -> (i32, i32) {
    %c0_i32 = arith.constant 0 : i32
    %c0_i32_0 = arith.constant 0 : i32
    return %arg0, %c0_i32 : i32, i32
  }
  func.func @transform_1(%arg0: i32) -> (i32, i32) {
    %c0_i32 = arith.constant 0 : i32
    %c0_i32_0 = arith.constant 0 : i32
    return %arg0, %c0_i32 : i32, i32
  }
  func.func @transform_2(%arg0: i32) -> (i32, i32) {
    %c0_i32 = arith.constant 0 : i32
    %c0_i32_0 = arith.constant 0 : i32
    %c0_i32_1 = arith.constant 0 : i32
    return %c0_i32, %c0_i32_0 : i32, i32
  }
  func.func @transform_3(%arg0: i32) -> (i32, i32) {
    %c0_i32 = arith.constant 0 : i32
    %c0_i32_0 = arith.constant 0 : i32
    %c0_i32_1 = arith.constant 0 : i32
    return %c0_i32, %c0_i32_0 : i32, i32
  }
}

</mosaic_0001>

<bundles_post_ra>
// kernel: tpu_custom_call.1
= control target key start
LH: loop header
LB: loop body
LE: loop exit
PB: predicated region body
PF: predicated region fallthrough
CT: control target
= control target key end

     0   :  { %vm18_vm0 = vcmask 130048   ;;  %v131_v2 = vmov 0   ;;  %s173_s0 = inlined_call_operand.vmem [shape: f32[8,16], index: 0, kind: input, shape index: {}]   ;;  %s174_s1 = inlined_call_operand.vmem [shape: s32[8,1], index: 1, kind: input, shape index: {}]   ;;  %s175_s2 = inlined_call_operand.vmem [shape: f32[1,16], index: 2, kind: input, shape index: {}]   ;;  %s176_s3 = inlined_call_operand.hbm [shape: f32[1,1], index: 3, kind: output, shape index: {}]  }
   0x1   :  { %v15_v0 = vld [vmem:[%s173_s0] sm:$0xff]  ;;  %97 = vset.pattern.permute.xlu0 %v131_v2 }
   0x2   :  { %v19_v1 = vsel %vm18_vm0, %v15_v0, -inf }
   0x3   :  { %8 = vsyncpa [#allocation3], 0  ;;  %20 = vmax.xlane.f32.xlu0 %v19_v1  ;;  %v16_v3 = vld [vmem:[%s174_s1] sm:$0xff]  ;;  %v30_v9 = vlaneseq  ;;  %vm60_vm2 = vcmask 0   ;;  %v132_v18 = vmov 0.0   ;;  %s133_s1 = smov [#allocation2]  }
   0x4   :  { %v98_v11 = vld [vmem:[%s175_s2] ss:$0 sm:$0xff]  ;;  %61 = vst.msk [vmem:[#allocation2] sm:$0x1] %vm60_vm2, %v132_v18  ;;  %s83_s2 = sshll.u32 %s133_s1, 4  ;;  %s85_s19 = sshll.u32 %s176_s3, 4  ;;  %s84_s2 = int_to_ptr.vmem [resolvable:$true] %s83_s2  ;;  %s86_s19 = int_to_ptr.hbm [resolvable:$true] %s85_s19 }
   0x5   :  { %v31_v10 = vand.u32 127, %v30_v9 }
   0xb   :  { %v62_v37 = vld [vmem:[#allocation2] sm:$0x1] }
  0x17   :  { %33 = vperm.xlu0 %97, %v16_v3  }
  0x76   :  { %v21_v4 = vpop.xlane.xlu0 %20 }
  0x77   :  { %v22_v5 = vsub.f32 %v15_v0, %v21_v4 }
  0x79   :  { %v23_v6 = vmul.f32 1.442695, %v22_v5 }
  0x7b   :  { %99 = vpow2.f32 %v23_v6 }
  0x81   :  { %v100_v7 = vpop.eup %99 }
  0x82   :  { %v25_v8 = vsel %vm18_vm0, %v100_v7, 0.0 }
  0x83   :  { %26 = vadd.xlane.f32.xlu1 %v25_v8 }
  0x89   :  { %v34_v12 = vpop.permute.xlu0 %33 }
  0x8a   :  { %vm35_vm1 = vcmp.eq.s32.totalorder %v31_v10, %v34_v12 }
  0x8b   :  { %v43_v13 = vsel %vm35_vm1, %v98_v11, 0.0  ;;  %v36_v14 = vsel %vm35_vm1, %v22_v5, 0.0 }
  0x8c   :  { %v44_v15 = vsel %vm18_vm0, %v43_v13, 0.0  ;;  %v37_v16 = vsel %vm18_vm0, %v36_v14, 0.0 }
  0x8d   :  { %45 = vadd.xlane.f32.xlu2 %v44_v15  ;;  %38 = vadd.xlane.f32.xlu1 %v37_v16 }
  0xf6   :  { %v27_v17 = vpop.xlane.xlu1 %26 }
  0xf7   :  { %101 = vlog2.f32 %v27_v17 }
  0xfd   :  { %v102_v19 = vpop.eup %101 }
  0xfe   :  { %v29_v20 = vmul.f32 0.6931472, %v102_v19 }
 0x100   :  { %v46_v21 = vpop.xlane.xlu2 %45  ;;  %v39_v22 = vpop.xlane.xlu1 %38 }
 0x101   :  { %v47_v23 = vsub.f32 0.0, %v46_v21  ;;  %v48_v24 = vsub.f32 %v39_v22, %v29_v20 }
 0x103   :  { %v49_v25 = vmul.f32 %v48_v24, %v47_v23 }
 0x105   :  { %v50_v26 = vsub.f32 0.0, %v49_v25 }
 0x107   :  { %v51_v27 = vmul.f32 1.442695, %v50_v26 }
 0x109   :  { %103 = vpow2.f32 %v51_v27 }
 0x10f   :  { %v104_v28 = vpop.eup %103 }
 0x110   :  { %v53_v29 = vsub.f32 1.0, %v104_v28 }
 0x112   :  { %v54_v30 = vmul.f32 %v53_v29, %v53_v29 }
 0x114   :  { %v55_v31 = vmul.f32 %v54_v30, %v49_v25 }
 0x116   :  { %v63_v32 = vrot.slane %v55_v31, 4 }
 0x118   :  { %v64_v33 = vadd.f32 %v63_v32, %v55_v31 }
 0x11a   :  { %v65_v34 = vrot.slane %v64_v33, 2 }
 0x11c   :  { %v66_v35 = vadd.f32 %v65_v34, %v64_v33 }
 0x11e   :  { %v67_v36 = vrot.slane %v66_v35, 1 }
 0x120   :  { %v68_v38 = vadd.f32 %v67_v36, %v66_v35 }
 0x122   :  { %v69_v39 = vadd.f32 %v68_v38, %v62_v37 }
 0x124   :  { %71 = vst.msk [vmem:[#allocation2] sm:$0x1] %vm60_vm2, %v69_v39 }
 0x12b   :  { %v75_v40 = vld [vmem:[#allocation2] sm:$0x1] }
 0x12c   :  { %v76_v41 = vmul.f32 0.125, %v75_v40 }
 0x12e   :  { %77 = vst.msk [vmem:[#allocation2] sm:$0x1] %vm60_vm2, %v76_v41 }
 0x12f   :  { %88 = dma.vmem_to_hbm [thread:$0]  %s84_s2, 16, %s86_s19, [#allocation3]  }
 0x130   :  { %129 = dma.done.wait [#allocation3], 16  }
 0x131   :  { %130 = vsyncadd [#allocation3], 4294967280 }
 0x132   :  { %93 = vsyncpa [#allocation3], 1 }

</bundles_post_ra>
